<compile_context>
chip_gen: v7x
topology: tpu7x:2x2x1
jax: 0.10.0
libtpu: 0.0.40
codegen_flags: <defaults>
</compile_context>

<pallas_src>
import functools

import jax
import jax.numpy as jnp
from jax.experimental import pallas as pl
from jax.experimental.pallas import tpu as pltpu


def _round_up(x: int, m: int) -> int:
    return (x + m - 1) // m * m


def _cdiv(a: int, b: int) -> int:
    return (a + b - 1) // b


def _pad_lane_dim(d: int) -> int:
    # v6e/v7x MXU is 256x256: align dims larger than one 128-lane tile to 256.
    # Dims <= 128 stay at 128 (doubling them would only double wasted compute;
    # on v5e's 128x128 MXU 128-alignment is already native).
    if d > 128:
        return _round_up(d, 256)
    return 128


def _fused_mlp_kernel(x_ref, *rest, num_layers: int, use_scratch: bool):
    """One row tile through the whole MLP: h = relu(h @ W_i + b_i); last layer no relu."""
    w_refs = rest[:num_layers]           # bf16 (K_i, N_i^pad), VMEM-resident
    b_ref = rest[num_layers]             # f32 (num_layers, max_N), VMEM-resident
    o_ref = rest[num_layers + 1]
    h_scr = rest[num_layers + 2] if use_scratch else None

    h = x_ref[...]                                        # (tm, K0) f32
    for i in range(num_layers):
        w = w_refs[i][...]
        n_i = w.shape[1]
        b = b_ref[i:i + 1, :n_i]                          # (1, N_i) f32, broadcasts over rows
        # bf16 operands on the MXU, f32 accumulation; bias add / ReLU in f32 on the VPU.
        h = jnp.dot(h.astype(w.dtype), w, preferred_element_type=jnp.float32) + b
        if i < num_layers - 1:
            h = jnp.maximum(h, 0.0)
            if h_scr is not None:
                # Stage the inter-layer activation through VMEM to bound vreg live
                # ranges of the unrolled layer stack.
                h_scr[:, :n_i] = h
                h = h_scr[:, :n_i]
    o_ref[...] = h.astype(o_ref.dtype)


def pallas_mlp_forward(x2d, weights, bias_stack, output_dim, *, tm_target: int = 256):
    """x2d: (M, K0) f32.  weights: list of bf16 (K_i, N_i^pad).  bias_stack: (L, max_N) f32."""
    M, in_dim = x2d.shape
    num_layers = len(weights)
    n_out_pad = weights[-1].shape[1]
    max_np = bias_stack.shape[1]

    # Adaptive row tile: aim for ~tm_target rows per step but always >= 2 grid steps when
    # M allows (keeps both v7x TensorCores busy).  cdiv grid + partial last block => no M
    # padding and no wrapper-side jnp.pad / row-slice HBM passes.
    n_tiles = max(2, _cdiv(M, tm_target))
    tm = min(_round_up(_cdiv(M, n_tiles), 8), _round_up(M, 8))
    grid_m = _cdiv(M, tm)

    flops = 0
    weight_bytes = 0
    for w in weights:
        kp, np_ = w.shape
        flops += 2 * M * kp * np_
        weight_bytes += kp * np_ * w.dtype.itemsize
    bias_bytes = bias_stack.size * bias_stack.dtype.itemsize

    max_hidden_np = max((w.shape[1] for w in weights[:-1]), default=0)
    use_scratch = num_layers > 1
    scratch_shapes = (
        [pltpu.VMEM((tm, max_hidden_np), jnp.float32)] if use_scratch else [])

    def _vmem_est(weight_factor: int) -> int:
        return (2 * tm * in_dim * 4                      # input tile (double buffered)
                + 2 * tm * n_out_pad * 4                 # output tile (double buffered)
                + weight_factor * (weight_bytes + bias_bytes)
                + (tm * max_hidden_np * 4 if use_scratch else 0)
                + 2 * tm * max(max_np, n_out_pad) * 4)   # live h / compiler scratch slack

    # Generation-aware VMEM budget: ~5/8 of physical per-TC VMEM (~40 MiB on v7x).
    try:
        vmem_cap = int(pltpu.get_tpu_info().vmem_capacity_bytes)
    except Exception:
        vmem_cap = 64 << 20          # assume the smallest (v7x per-TC) when unknown
    hard_cap = max(16 << 20, min((vmem_cap * 5) // 8, 96 << 20))

    cost = pl.CostEstimate(
        flops=flops,
        transcendentals=0,
        bytes_accessed=(M * in_dim * 4 + weight_bytes + bias_bytes + M * n_out_pad * 4),
    )

    def build(single_buffer_resident: bool):
        resident_kwargs = (
            dict(pipeline_mode=pl.Buffered(1)) if single_buffer_resident else {})
        in_specs = [pl.BlockSpec((tm, in_dim), lambda i: (i, 0))]
        for w in weights:
            kp, np_ = w.shape
            # Constant index_map -> block fetched once, stays VMEM-resident across grid.
            in_specs.append(pl.BlockSpec((kp, np_), lambda i: (0, 0), **resident_kwargs))
        in_specs.append(
            pl.BlockSpec((num_layers, max_np), lambda i: (0, 0), **resident_kwargs))
        out_specs = pl.BlockSpec((tm, n_out_pad), lambda i: (i, 0))

        vmem_est = _vmem_est(1 if single_buffer_resident else 2)
        assert vmem_est < hard_cap, (
            "fused MLP working set too large for VMEM; use a K/N-tiled per-layer kernel")
        vmem_limit = min(max(vmem_est + (4 << 20), 16 << 20), hard_cap)

        kernel = functools.partial(
            _fused_mlp_kernel, num_layers=num_layers, use_scratch=use_scratch)

        return pl.pallas_call(
            kernel,
            out_shape=jax.ShapeDtypeStruct((M, n_out_pad), x2d.dtype),
            grid_spec=pltpu.PrefetchScalarGridSpec(
                num_scalar_prefetch=0,
                grid=(grid_m,),
                in_specs=in_specs,
                out_specs=out_specs,
                scratch_shapes=scratch_shapes,
            ),
            compiler_params=pltpu.CompilerParams(
                dimension_semantics=("parallel",),
                vmem_limit_bytes=vmem_limit,
            ),
            cost_estimate=cost,
        )

    inputs = [x2d, *weights, bias_stack]
    try:
        out_pad = build(True)(*inputs)
    except Exception:
        # Fallback for Pallas builds without BlockSpec(pipeline_mode=...): default
        # (double-buffered) resident blocks.
        out_pad = build(False)(*inputs)

    if output_dim == n_out_pad:
        return out_pad
    return out_pad[:, :output_dim]


class PallasMLP:
    """JAX/Pallas equivalent of the PyTorch MLP module (forward pass)."""

    def __init__(self, input_dim, hidden_dim, output_dim, num_layers, key):
        self.num_layers = num_layers
        self.output_dim = output_dim
        h = [hidden_dim] * (num_layers - 1)
        in_dims = [input_dim] + h
        out_dims = h + [output_dim]

        self.params = []            # unpadded f32 (K, N) so y = x @ W + b == F.linear
        padded_w = []
        padded_b = []
        max_np = max(_pad_lane_dim(n) for n in out_dims)
        for k_in, n_out in zip(in_dims, out_dims):
            key, wk, bk = jax.random.split(key, 3)
            bound = 1.0 / float(k_in) ** 0.5     # ~ nn.Linear default uniform init
            w = jax.random.uniform(wk, (k_in, n_out), jnp.float32, -bound, bound)
            b = jax.random.uniform(bk, (n_out,), jnp.float32, -bound, bound)
            self.params.append((w, b))

            np_ = _pad_lane_dim(n_out)
            # Only the N (lane) dim is padded; layer 0 keeps its true K, later layers
            # take K = previous layer's padded N (extra rows are exact zeros).
            kp = k_in if not padded_w else padded_w[-1].shape[1]
            wp = jnp.zeros((kp, np_), jnp.float32).at[:k_in, :n_out].set(w)
            padded_w.append(wp.astype(jnp.bfloat16))        # MXU-native bf16 weights
            padded_b.append(jnp.pad(b, (0, max_np - n_out)))

        self.weights = padded_w
        self.bias_stack = jnp.stack(padded_b, axis=0)        # (L, max_np) f32

    def __call__(self, x):
        orig_shape = x.shape
        x2d = x.reshape(-1, orig_shape[-1])
        y2d = pallas_mlp_forward(x2d, self.weights, self.bias_stack, self.output_dim)
        return y2d.reshape(*orig_shape[:-1], self.output_dim)


def _reference_mlp(x, params, num_layers):
    """Pure-JAX reference mimicking the kernel's bf16-weight / f32-accumulate math."""
    y = x.reshape(-1, x.shape[-1])
    for i, (w, b) in enumerate(params):
        y = jnp.dot(y.astype(jnp.bfloat16), w.astype(jnp.bfloat16),
                    preferred_element_type=jnp.float32) + b
        if i < num_layers - 1:
            y = jnp.maximum(y, 0.0)
    return y.reshape(*x.shape[:-1], y.shape[-1])


if __name__ == "__main__":
    key = jax.random.PRNGKey(0)
    key, xkey, pkey = jax.random.split(key, 3)

    # small shapes consistent with the module: (batch, seq, input_dim)
    batch, seq = 2, 8
    input_dim, hidden_dim, output_dim, num_layers = 32, 64, 16, 3

    x = jax.random.normal(xkey, (batch, seq, input_dim), jnp.float32)

    mlp = PallasMLP(input_dim, hidden_dim, output_dim, num_layers, pkey)
    out = jax.block_until_ready(mlp(x))

    ref = _reference_mlp(x, mlp.params, num_layers)
    assert out.shape == (batch, seq, output_dim)
    assert jnp.allclose(out, ref, atol=2e-3, rtol=2e-3), float(jnp.abs(out - ref).max())

    print("KERNEL_OK")
</pallas_src>

<mosaic_0001>
module attributes {stable_mosaic.version = 11 : i64} {
  func.func @_fused_mlp_kernel(%arg0: i32, %arg1: memref<8x32xf32, #tpu.memory_space<vmem>>, %arg2: memref<32x128xbf16, #tpu.memory_space<vmem>>, %arg3: memref<128x128xbf16, #tpu.memory_space<vmem>>, %arg4: memref<128x128xbf16, #tpu.memory_space<vmem>>, %arg5: memref<3x128xf32, #tpu.memory_space<vmem>>, %arg6: memref<8x128xf32, #tpu.memory_space<vmem>>, %arg7: memref<8x128xf32, #tpu.memory_space<vmem>>) attributes {dimension_semantics = [#tpu.dimension_semantics<parallel>], iteration_bounds = array<i64: 2>, scalar_prefetch = 0 : i64, scratch_operands = 1 : i64, tpu.core_type = #tpu.core_type<tc>, window_params = [{transform_indices = @transform_0, window_bounds = array<i64: 8, 32>}, {pipeline_mode = #tpu.pipeline_mode<synchronous>, transform_indices = @transform_1, window_bounds = array<i64: 32, 128>}, {pipeline_mode = #tpu.pipeline_mode<synchronous>, transform_indices = @transform_2, window_bounds = array<i64: 128, 128>}, {pipeline_mode = #tpu.pipeline_mode<synchronous>, transform_indices = @transform_3, window_bounds = array<i64: 128, 128>}, {pipeline_mode = #tpu.pipeline_mode<synchronous>, transform_indices = @transform_4, window_bounds = array<i64: 3, 128>}, {transform_indices = @transform_5, window_bounds = array<i64: 8, 128>}]} {
    %c0 = arith.constant 0 : index
    %c0_0 = arith.constant 0 : index
    %0 = vector.load %arg1[%c0, %c0_0] : memref<8x32xf32, #tpu.memory_space<vmem>>, vector<8x32xf32>
    %c0_1 = arith.constant 0 : index
    %c0_2 = arith.constant 0 : index
    %1 = vector.load %arg2[%c0_1, %c0_2] : memref<32x128xbf16, #tpu.memory_space<vmem>>, vector<32x128xbf16>
    %c0_3 = arith.constant 0 : index
    %c0_4 = arith.constant 0 : index
    %2 = vector.load %arg5[%c0_3, %c0_4] : memref<3x128xf32, #tpu.memory_space<vmem>>, vector<1x128xf32>
    %3 = arith.truncf %0 : vector<8x32xf32> to vector<8x32xbf16>
    %cst = arith.constant dense<0.000000e+00> : vector<8x128xf32>
    %4 = tpu.matmul %3, %1, %cst {dimension_numbers = #tpu.dot_dimension_numbers<[1], [0], [0], [1], [0, 0, 1, 1], [], []>} : vector<8x32xbf16>, vector<32x128xbf16>, vector<8x128xf32> -> vector<8x128xf32>
    %5 = vector.broadcast %2 : vector<1x128xf32> to vector<8x128xf32>
    %6 = arith.addf %4, %5 : vector<8x128xf32>
    %cst_5 = arith.constant 0.000000e+00 : f32
    %7 = vector.broadcast %cst_5 : f32 to vector<8x128xf32>
    %8 = arith.maximumf %6, %7 : vector<8x128xf32>
    %c0_6 = arith.constant 0 : index
    %c0_7 = arith.constant 0 : index
    %9 = vector.load %arg7[%c0_6, %c0_7] : memref<8x128xf32, #tpu.memory_space<vmem>>, vector<8x128xf32>
    tpu.vector_store %arg7[%c0_6, %c0_7], %8 {strides = array<i32>} : memref<8x128xf32, #tpu.memory_space<vmem>>, vector<8x128xf32>,
    %c0_8 = arith.constant 0 : index
    %c0_9 = arith.constant 0 : index
    %10 = vector.load %arg7[%c0_8, %c0_9] : memref<8x128xf32, #tpu.memory_space<vmem>>, vector<8x128xf32>
    %c0_10 = arith.constant 0 : index
    %c0_11 = arith.constant 0 : index
    %11 = vector.load %arg3[%c0_10, %c0_11] : memref<128x128xbf16, #tpu.memory_space<vmem>>, vector<128x128xbf16>
    %c1 = arith.constant 1 : index
    %c0_12 = arith.constant 0 : index
    %12 = vector.load %arg5[%c1, %c0_12] : memref<3x128xf32, #tpu.memory_space<vmem>>, vector<1x128xf32>
    %13 = arith.truncf %10 : vector<8x128xf32> to vector<8x128xbf16>
    %cst_13 = arith.constant dense<0.000000e+00> : vector<8x128xf32>
    %14 = tpu.matmul %13, %11, %cst_13 {dimension_numbers = #tpu.dot_dimension_numbers<[1], [0], [0], [1], [0, 0, 1, 1], [], []>} : vector<8x128xbf16>, vector<128x128xbf16>, vector<8x128xf32> -> vector<8x128xf32>
    %15 = vector.broadcast %12 : vector<1x128xf32> to vector<8x128xf32>
    %16 = arith.addf %14, %15 : vector<8x128xf32>
    %cst_14 = arith.constant 0.000000e+00 : f32
    %17 = vector.broadcast %cst_14 : f32 to vector<8x128xf32>
    %18 = arith.maximumf %16, %17 : vector<8x128xf32>
    %c0_15 = arith.constant 0 : index
    %c0_16 = arith.constant 0 : index
    %19 = vector.load %arg7[%c0_15, %c0_16] : memref<8x128xf32, #tpu.memory_space<vmem>>, vector<8x128xf32>
    tpu.vector_store %arg7[%c0_15, %c0_16], %18 {strides = array<i32>} : memref<8x128xf32, #tpu.memory_space<vmem>>, vector<8x128xf32>,
    %c0_17 = arith.constant 0 : index
    %c0_18 = arith.constant 0 : index
    %20 = vector.load %arg7[%c0_17, %c0_18] : memref<8x128xf32, #tpu.memory_space<vmem>>, vector<8x128xf32>
    %c0_19 = arith.constant 0 : index
    %c0_20 = arith.constant 0 : index
    %21 = vector.load %arg4[%c0_19, %c0_20] : memref<128x128xbf16, #tpu.memory_space<vmem>>, vector<128x128xbf16>
    %c2 = arith.constant 2 : index
    %c0_21 = arith.constant 0 : index
    %22 = vector.load %arg5[%c2, %c0_21] : memref<3x128xf32, #tpu.memory_space<vmem>>, vector<1x128xf32>
    %23 = arith.truncf %20 : vector<8x128xf32> to vector<8x128xbf16>
    %cst_22 = arith.constant dense<0.000000e+00> : vector<8x128xf32>
    %24 = tpu.matmul %23, %21, %cst_22 {dimension_numbers = #tpu.dot_dimension_numbers<[1], [0], [0], [1], [0, 0, 1, 1], [], []>} : vector<8x128xbf16>, vector<128x128xbf16>, vector<8x128xf32> -> vector<8x128xf32>
    %25 = vector.broadcast %22 : vector<1x128xf32> to vector<8x128xf32>
    %26 = arith.addf %24, %25 : vector<8x128xf32>
    %c0_23 = arith.constant 0 : index
    %c0_24 = arith.constant 0 : index
    %27 = vector.load %arg6[%c0_23, %c0_24] : memref<8x128xf32, #tpu.memory_space<vmem>>, vector<8x128xf32>
    tpu.vector_store %arg6[%c0_23, %c0_24], %26 {strides = array<i32>} : memref<8x128xf32, #tpu.memory_space<vmem>>, vector<8x128xf32>,
    return
  }
  func.func @transform_0(%arg0: i32) -> (i32, i32) {
    %c0_i32 = arith.constant 0 : i32
    %c0_i32_0 = arith.constant 0 : i32
    return %arg0, %c0_i32 : i32, i32
  }
  func.func @transform_1(%arg0: i32) -> (i32, i32) {
    %c0_i32 = arith.constant 0 : i32
    %c0_i32_0 = arith.constant 0 : i32
    %c0_i32_1 = arith.constant 0 : i32
    return %c0_i32, %c0_i32_0 : i32, i32
  }
  func.func @transform_2(%arg0: i32) -> (i32, i32) {
    %c0_i32 = arith.constant 0 : i32
    %c0_i32_0 = arith.constant 0 : i32
    %c0_i32_1 = arith.constant 0 : i32
    return %c0_i32, %c0_i32_0 : i32, i32
  }
  func.func @transform_3(%arg0: i32) -> (i32, i32) {
    %c0_i32 = arith.constant 0 : i32
    %c0_i32_0 = arith.constant 0 : i32
    %c0_i32_1 = arith.constant 0 : i32
    return %c0_i32, %c0_i32_0 : i32, i32
  }
  func.func @transform_4(%arg0: i32) -> (i32, i32) {
    %c0_i32 = arith.constant 0 : i32
    %c0_i32_0 = arith.constant 0 : i32
    %c0_i32_1 = arith.constant 0 : i32
    return %c0_i32, %c0_i32_0 : i32, i32
  }
  func.func @transform_5(%arg0: i32) -> (i32, i32) {
    %c0_i32 = arith.constant 0 : i32
    %c0_i32_0 = arith.constant 0 : i32
    return %arg0, %c0_i32 : i32, i32
  }
}

module attributes {stable_mosaic.version = 11 : i64} {
  func.func @_fused_mlp_kernel(%arg0: i32, %arg1: memref<8x32xf32, #tpu.memory_space<vmem>>, %arg2: memref<32x128xbf16, #tpu.memory_space<vmem>>, %arg3: memref<128x128xbf16, #tpu.memory_space<vmem>>, %arg4: memref<128x128xbf16, #tpu.memory_space<vmem>>, %arg5: memref<3x128xf32, #tpu.memory_space<vmem>>, %arg6: memref<8x128xf32, #tpu.memory_space<vmem>>, %arg7: memref<8x128xf32, #tpu.memory_space<vmem>>) attributes {dimension_semantics = [#tpu.dimension_semantics<parallel>], iteration_bounds = array<i64: 2>, scalar_prefetch = 0 : i64, scratch_operands = 1 : i64, tpu.core_type = #tpu.core_type<tc>, window_params = [{transform_indices = @transform_0, window_bounds = array<i64: 8, 32>}, {pipeline_mode = #tpu.pipeline_mode<synchronous>, transform_indices = @transform_1, window_bounds = array<i64: 32, 128>}, {pipeline_mode = #tpu.pipeline_mode<synchronous>, transform_indices = @transform_2, window_bounds = array<i64: 128, 128>}, {pipeline_mode = #tpu.pipeline_mode<synchronous>, transform_indices = @transform_3, window_bounds = array<i64: 128, 128>}, {pipeline_mode = #tpu.pipeline_mode<synchronous>, transform_indices = @transform_4, window_bounds = array<i64: 3, 128>}, {transform_indices = @transform_5, window_bounds = array<i64: 8, 128>}]} {
    %c0 = arith.constant 0 : index
    %c0_0 = arith.constant 0 : index
    %0 = vector.load %arg1[%c0, %c0_0] : memref<8x32xf32, #tpu.memory_space<vmem>>, vector<8x32xf32>
    %c0_1 = arith.constant 0 : index
    %c0_2 = arith.constant 0 : index
    %1 = vector.load %arg2[%c0_1, %c0_2] : memref<32x128xbf16, #tpu.memory_space<vmem>>, vector<32x128xbf16>
    %c0_3 = arith.constant 0 : index
    %c0_4 = arith.constant 0 : index
    %2 = vector.load %arg5[%c0_3, %c0_4] : memref<3x128xf32, #tpu.memory_space<vmem>>, vector<1x128xf32>
    %3 = arith.truncf %0 : vector<8x32xf32> to vector<8x32xbf16>
    %cst = arith.constant dense<0.000000e+00> : vector<8x128xf32>
    %4 = tpu.matmul %3, %1, %cst {dimension_numbers = #tpu.dot_dimension_numbers<[1], [0], [0], [1], [0, 0, 1, 1], [], []>} : vector<8x32xbf16>, vector<32x128xbf16>, vector<8x128xf32> -> vector<8x128xf32>
    %5 = vector.broadcast %2 : vector<1x128xf32> to vector<8x128xf32>
    %6 = arith.addf %4, %5 : vector<8x128xf32>
    %cst_5 = arith.constant 0.000000e+00 : f32
    %7 = vector.broadcast %cst_5 : f32 to vector<8x128xf32>
    %8 = arith.maximumf %6, %7 : vector<8x128xf32>
    %c0_6 = arith.constant 0 : index
    %c0_7 = arith.constant 0 : index
    %9 = vector.load %arg7[%c0_6, %c0_7] : memref<8x128xf32, #tpu.memory_space<vmem>>, vector<8x128xf32>
    tpu.vector_store %arg7[%c0_6, %c0_7], %8 {strides = array<i32>} : memref<8x128xf32, #tpu.memory_space<vmem>>, vector<8x128xf32>,
    %c0_8 = arith.constant 0 : index
    %c0_9 = arith.constant 0 : index
    %10 = vector.load %arg7[%c0_8, %c0_9] : memref<8x128xf32, #tpu.memory_space<vmem>>, vector<8x128xf32>
    %c0_10 = arith.constant 0 : index
    %c0_11 = arith.constant 0 : index
    %11 = vector.load %arg3[%c0_10, %c0_11] : memref<128x128xbf16, #tpu.memory_space<vmem>>, vector<128x128xbf16>
    %c1 = arith.constant 1 : index
    %c0_12 = arith.constant 0 : index
    %12 = vector.load %arg5[%c1, %c0_12] : memref<3x128xf32, #tpu.memory_space<vmem>>, vector<1x128xf32>
    %13 = arith.truncf %10 : vector<8x128xf32> to vector<8x128xbf16>
    %cst_13 = arith.constant dense<0.000000e+00> : vector<8x128xf32>
    %14 = tpu.matmul %13, %11, %cst_13 {dimension_numbers = #tpu.dot_dimension_numbers<[1], [0], [0], [1], [0, 0, 1, 1], [], []>} : vector<8x128xbf16>, vector<128x128xbf16>, vector<8x128xf32> -> vector<8x128xf32>
    %15 = vector.broadcast %12 : vector<1x128xf32> to vector<8x128xf32>
    %16 = arith.addf %14, %15 : vector<8x128xf32>
    %cst_14 = arith.constant 0.000000e+00 : f32
    %17 = vector.broadcast %cst_14 : f32 to vector<8x128xf32>
    %18 = arith.maximumf %16, %17 : vector<8x128xf32>
    %c0_15 = arith.constant 0 : index
    %c0_16 = arith.constant 0 : index
    %19 = vector.load %arg7[%c0_15, %c0_16] : memref<8x128xf32, #tpu.memory_space<vmem>>, vector<8x128xf32>
    tpu.vector_store %arg7[%c0_15, %c0_16], %18 {strides = array<i32>} : memref<8x128xf32, #tpu.memory_space<vmem>>, vector<8x128xf32>,
    %c0_17 = arith.constant 0 : index
    %c0_18 = arith.constant 0 : index
    %20 = vector.load %arg7[%c0_17, %c0_18] : memref<8x128xf32, #tpu.memory_space<vmem>>, vector<8x128xf32>
    %c0_19 = arith.constant 0 : index
    %c0_20 = arith.constant 0 : index
    %21 = vector.load %arg4[%c0_19, %c0_20] : memref<128x128xbf16, #tpu.memory_space<vmem>>, vector<128x128xbf16>
    %c2 = arith.constant 2 : index
    %c0_21 = arith.constant 0 : index
    %22 = vector.load %arg5[%c2, %c0_21] : memref<3x128xf32, #tpu.memory_space<vmem>>, vector<1x128xf32>
    %23 = arith.truncf %20 : vector<8x128xf32> to vector<8x128xbf16>
    %cst_22 = arith.constant dense<0.000000e+00> : vector<8x128xf32>
    %24 = tpu.matmul %23, %21, %cst_22 {dimension_numbers = #tpu.dot_dimension_numbers<[1], [0], [0], [1], [0, 0, 1, 1], [], []>} : vector<8x128xbf16>, vector<128x128xbf16>, vector<8x128xf32> -> vector<8x128xf32>
    %25 = vector.broadcast %22 : vector<1x128xf32> to vector<8x128xf32>
    %26 = arith.addf %24, %25 : vector<8x128xf32>
    %c0_23 = arith.constant 0 : index
    %c0_24 = arith.constant 0 : index
    %27 = vector.load %arg6[%c0_23, %c0_24] : memref<8x128xf32, #tpu.memory_space<vmem>>, vector<8x128xf32>
    tpu.vector_store %arg6[%c0_23, %c0_24], %26 {strides = array<i32>} : memref<8x128xf32, #tpu.memory_space<vmem>>, vector<8x128xf32>,
    return
  }
  func.func @transform_0(%arg0: i32) -> (i32, i32) {
    %c0_i32 = arith.constant 0 : i32
    %c0_i32_0 = arith.constant 0 : i32
    return %arg0, %c0_i32 : i32, i32
  }
  func.func @transform_1(%arg0: i32) -> (i32, i32) {
    %c0_i32 = arith.constant 0 : i32
    %c0_i32_0 = arith.constant 0 : i32
    %c0_i32_1 = arith.constant 0 : i32
    return %c0_i32, %c0_i32_0 : i32, i32
  }
  func.func @transform_2(%arg0: i32) -> (i32, i32) {
    %c0_i32 = arith.constant 0 : i32
    %c0_i32_0 = arith.constant 0 : i32
    %c0_i32_1 = arith.constant 0 : i32
    return %c0_i32, %c0_i32_0 : i32, i32
  }
  func.func @transform_3(%arg0: i32) -> (i32, i32) {
    %c0_i32 = arith.constant 0 : i32
    %c0_i32_0 = arith.constant 0 : i32
    %c0_i32_1 = arith.constant 0 : i32
    return %c0_i32, %c0_i32_0 : i32, i32
  }
  func.func @transform_4(%arg0: i32) -> (i32, i32) {
    %c0_i32 = arith.constant 0 : i32
    %c0_i32_0 = arith.constant 0 : i32
    %c0_i32_1 = arith.constant 0 : i32
    return %c0_i32, %c0_i32_0 : i32, i32
  }
  func.func @transform_5(%arg0: i32) -> (i32, i32) {
    %c0_i32 = arith.constant 0 : i32
    %c0_i32_0 = arith.constant 0 : i32
    return %arg0, %c0_i32 : i32, i32
  }
}

</mosaic_0001>

<bundles_post_ra>
// kernel: tpu_custom_call.1
= control target key start
LH: loop header
LB: loop body
LE: loop exit
PB: predicated region body
PF: predicated region fallthrough
CT: control target
= control target key end

     0   :  { %10 = vsyncpa [#allocation4], 0  ;;  %s1429_s0 = inlined_call_operand.hbm [shape: f32[16,32], index: 0, kind: input, shape index: {}]   ;;  %s1430_s1 = inlined_call_operand.hbm [shape: bf16[32,128], index: 1, kind: input, shape index: {}]   ;;  %s1431_s2 = inlined_call_operand.hbm [shape: bf16[128,128], index: 2, kind: input, shape index: {}]   ;;  %s1432_s3 = inlined_call_operand.hbm [shape: bf16[128,128], index: 3, kind: input, shape index: {}]   ;;  %s1433_s4 = inlined_call_operand.vmem [shape: f32[3,128], index: 4, kind: input, shape index: {}]   ;;  %s1434_s5 = inlined_call_operand.hbm [shape: f32[16,128], index: 5, kind: output, shape index: {}]  }
   0x1   :  { %12 = vsyncpa [#allocation4 + $0x1], 0 }
   0x2   :  { %13 = vsyncpa [#allocation7], 0 }
   0x3   :  { %14 = vsyncpa [#allocation10], 0 }
   0x4   :  { %15 = vsyncpa [#allocation5], 0 }
   0x5   :  { %17 = vsyncpa [#allocation5 + $0x1], 0  ;;  %s1129_s18 = smov 0   ;;  %s1131_s19 = smov 0  }
   0x6   :  { %s1133_s20 = smov 0   ;;  %s1135_s21 = smov 0  }
   0x7 LB: > { %s1150_s22 = sadd.s32 4294967295, %s1088_s21   ;;  %s692_s23 = sadd.s32 4294967294, %s1088_s21   ;;  %s1088_s21 = sphi %s1135_s21, %s1457_s21   ;;  %s1084_s20 = sphi %s1133_s20, %s1456_s20   ;;  %s1080_s19 = sphi %s1131_s19, %s1455_s19   ;;  %s1076_s18 = sphi %s1129_s18, %s1454_s18  }
   0x8   : > { %p43_p0 = scmp.ne.s32.totalorder %s1080_s19, %s1076_s18  ;;  %p1435_p1 = scmp.eq.s32.totalorder %s1150_s22, 0 }
   0x9   : > { %p157_p3 = scmp.eq.s32.totalorder %s692_s23, 1  ;;  %p693_p5 = scmp.ge.s32.totalorder %s1088_s21, 1 }
   0xa   : > { %p1159_p4 = por %p1435_p1, %p43_p0  ;;  %p164_p7 = scmp.lt.s32.totalorder %s1088_s21, 3 }
   0xb   : > { %p1164_p6 = por %p157_p3, %p43_p0  ;;  %s1090_s27 = smov [#allocation6]  }
   0xc   : > { %s1438_s24 = scalar_select %p1159_p4, 1, 0 }
   0xd   : > { %s1439_s25 = scalar_select %p1164_p6, 1, 0 }
   0xe   : > { %p1169_p8 = pnand %p693_p5, %p164_p7  ;;  %s176_s28 = sshll.u32 %s1090_s27, 4  ;;  %s1173_s28 = int_to_ptr.vmem [resolvable:$true] %s176_s28 }
   0xf   : > { %s1091_s30 = smov [#allocation8]   ;;  %s1092_s7 = smov [#allocation9]  }
  0x10   : > { %s1440_s26 = scalar_select %p1169_p8, 1, 0 }
  0x11   : > { %p817_p9 = pneg %p1169_p8  ;;  %s189_s6 = sshll.u32 %s1091_s30, 4  ;;  %s1184_s6 = int_to_ptr.vmem [resolvable:$true] %s189_s6 }
  0x12   : > { %s1186_s8 = sshll.u32 %s1092_s7, 4  ;;  %s900_s11 = scalar_lea.hbm %s1430_s1, 256  ;;  %s203_s8 = int_to_ptr.vmem [resolvable:$true] %s1186_s8 }
  0x13   : > { %p1180_p11 = pnand %p817_p9, %p1435_p1  ;;  %p901_p12 = scmp.ne.s32.totalorder %s1430_s1, %s900_s11 }
  0x14   : > { %p907_p5 = scmp.lt.u32.totalorder %s900_s11, %s1430_s1 }
  0x15   : > { %p1196_p13 = pneg %p1180_p11 }
  0x17   : > { %p903_p0 = pnand %p1196_p13, %p901_p12 }
  0x19   : > { %p904_p3 = pneg %p903_p0 }
  0x1b   : > { %p909_p7 = pnand %p907_p5, %p904_p3 }
  0x1d   : > { %912 = shalt.err (!%p909_p7)
}
  0x1e   : > { %s913_s17 = scalar_lea.vmem %s1173_s28, 256  ;;  %p921_p2 = scmp.lt.s32.totalorder %s1173_s28, %s1173_s28 }
  0x1f   : > { %p914_p9 = scmp.ne.s32.totalorder %s1173_s28, %s913_s17  ;;  %p922_p6 = scmp.lt.s32.totalorder %s913_s17, %s913_s17 }
  0x21   : > { %p916_p10 = pnand %p914_p9, %p1196_p13  ;;  %p923_p12 = por %p922_p6, %p921_p2 }
  0x23   : > { %p917_p1 = pneg %p916_p10 }
  0x25   : > { %p924_p0 = pnand %p923_p12, %p917_p1 }
  0x27   : > { %927 = shalt.err (!%p924_p0)
}
  0x28   : > { %s1093_s23 = smov 64   ;;  %s1094_s27 = smov 4  }
  0x29   : > { %820 = dma.hbm_to_vmem [thread:$0]  (!%p1180_p11), %s1430_s1, 256, %s1173_s28, [#allocation7], %s1093_s23, %s1093_s23, %s1094_s27  }
  0x2a   : > { %s928_s11 = scalar_lea.hbm %s1431_s2, 1024 }
  0x2b   : > { %p929_p1 = scmp.ne.s32.totalorder %s1431_s2, %s928_s11  ;;  %p935_p10 = scmp.lt.u32.totalorder %s928_s11, %s1431_s2 }
  0x2d   : > { %p931_p2 = pnand %p929_p1, %p1196_p13 }
  0x2f   : > { %p932_p6 = pneg %p931_p2 }
  0x31   : > { %p937_p3 = pnand %p935_p10, %p932_p6 }
  0x33   : > { %940 = shalt.err (!%p937_p3)
}
  0x34   : > { %s941_s28 = scalar_lea.vmem %s1184_s6, 1024  ;;  %p949_p12 = scmp.lt.s32.totalorder %s1184_s6, %s1184_s6 }
  0x35   : > { %p942_p5 = scmp.ne.s32.totalorder %s1184_s6, %s941_s28  ;;  %p950_p0 = scmp.lt.s32.totalorder %s941_s28, %s941_s28 }
  0x37   : > { %p944_p7 = pnand %p942_p5, %p1196_p13  ;;  %p951_p1 = por %p950_p0, %p949_p12 }
  0x39   : > { %p945_p9 = pneg %p944_p7 }
  0x3b   : > { %p952_p2 = pnand %p951_p1, %p945_p9 }
  0x3d   : > { %955 = shalt.err (!%p952_p2)
}
  0x3e   : > { %823 = dma.hbm_to_vmem [thread:$0]  (!%p1180_p11), %s1431_s2, 1024, %s1184_s6, [#allocation7], %s1093_s23, %s1093_s23, %s1094_s27  }
  0x3f   : > { %s956_s10 = scalar_lea.hbm %s1432_s3, 1024 }
  0x40   : > { %p957_p6 = scmp.ne.s32.totalorder %s1432_s3, %s956_s10  ;;  %p963_p5 = scmp.lt.u32.totalorder %s956_s10, %s1432_s3 }
  0x42   : > { %p959_p10 = pnand %p957_p6, %p1196_p13 }
  0x44   : > { %p960_p3 = pneg %p959_p10 }
  0x46   : > { %p965_p7 = pnand %p963_p5, %p960_p3 }
  0x48   : > { %968 = shalt.err (!%p965_p7)
}
  0x49   : > { %s969_s16 = scalar_lea.vmem %s203_s8, 1024  ;;  %p977_p1 = scmp.lt.s32.totalorder %s203_s8, %s203_s8 }
  0x4a   : > { %p970_p9 = scmp.ne.s32.totalorder %s203_s8, %s969_s16  ;;  %p978_p2 = scmp.lt.s32.totalorder %s969_s16, %s969_s16 }
  0x4c   : > { %p972_p12 = pnand %p970_p9, %p1196_p13  ;;  %p979_p4 = por %p978_p2, %p977_p1 }
  0x4e   : > { %p973_p0 = pneg %p972_p12 }
  0x50   : > { %p980_p8 = pnand %p979_p4, %p973_p0 }
  0x52   : > { %983 = shalt.err (!%p980_p8)
}
  0x53   : > { %826 = dma.hbm_to_vmem [thread:$0]  (!%p1180_p11), %s1432_s3, 1024, %s203_s8, [#allocation10], %s1093_s23, %s1093_s23, %s1094_s27  }
  0x54   : > { %s1269_s14 = sadd.s32 1, %s1088_s21   ;;  %s30_s17 = sadd.s32 1, %s1084_s20 }
  0x55   : > { %s27_s29 = ssub.s32 %s1088_s21, %s1269_s14  ;;  %p37_p8 = scmp.ne.s32.totalorder %s1084_s20, %s1080_s19 }
  0x56   : > { %p28_p4 = scmp.eq.s32.totalorder %s27_s29, 0  ;;  %p38_p13 = scmp.eq.s32.totalorder %s1088_s21, 0 }
  0x57   : > { %p838_p6 = scmp.lt.s32.totalorder %s1088_s21, 2  ;;  %p1443_p3 = scmp.eq.s32.totalorder %s1150_s22, 1 }
  0x58   : > { %s1279_s30 = scalar_select %p28_p4, %s1084_s20, %s30_s17  }
  0x59   : > { %p39_p10 = por %p38_p13, %p37_p8  ;;  %p1283_p5 = por %p1443_p3, %p37_p8 }
  0x5a   : > { %s219_s9 = sand.u32 1, %s1084_s20   ;;  %s699_s10 = sshll.u32 %s1088_s21, 7 }
  0x5b   : > { %s698_s8 = sshll.u32 %s219_s9, 3  ;;  %s1292_s11 = scalar_lea.hbm %s1429_s0, %s699_s10 }
  0x5c   : > { %s223_s12 = scalar_lea.vmem [#allocation3], %s698_s8  ;;  %p1294_p11 = pnand %p838_p6, %p39_p10 }
  0x5d   : > { %s230_s13 = sshll.u32 %s223_s12, 4  ;;  %s220_s16 = scalar_lea.sflag [#allocation4], %s219_s9  ;;  %s1298_s13 = int_to_ptr.vmem [resolvable:$true] %s230_s13 }
  0x5e   : > { %s984_s6 = scalar_lea.hbm %s1292_s11, 128  ;;  %p986_p9 = pneg %p1294_p11 }
  0x5f   : > { %p985_p7 = scmp.ne.s32.totalorder %s1292_s11, %s984_s6  ;;  %s989_s17 = scalar_lea.hbm %s1429_s0, 256 }
  0x60   : > { %p990_p1 = scmp.lt.u32.totalorder %s1292_s11, %s1429_s0  ;;  %p991_p2 = scmp.lt.u32.totalorder %s989_s17, %s984_s6 }
  0x61   : > { %p987_p12 = pnand %p986_p9, %p985_p7  ;;  %p993_p8 = scmp.lt.u32.totalorder %s984_s6, %s1292_s11 }
  0x62   : > { %p992_p4 = por %p991_p2, %p990_p1 }
  0x63   : > { %p988_p0 = pneg %p987_p12 }
  0x64   : > { %p994_p13 = por %p993_p8, %p992_p4 }
  0x66   : > { %p995_p6 = pnand %p994_p13, %p988_p0 }
  0x68   : > { %998 = shalt.err (!%p995_p6)
}
  0x69   : > { %s999_s9 = scalar_lea.vmem %s1298_s13, 128  ;;  %s1095_s23 = smov [#allocation3]  }
  0x6a   : > { %p1000_p10 = scmp.ne.s32.totalorder %s1298_s13, %s999_s9  ;;  %s1004_s27 = sshll.u32 %s1095_s23, 4  ;;  %s1005_s27 = int_to_ptr.vmem [resolvable:$false] %s1004_s27 }
  0x6b   : > { %s1006_s12 = scalar_lea.vmem %s1005_s27, 256  ;;  %p1007_p12 = scmp.lt.s32.totalorder %s1298_s13, %s1005_s27 }
  0x6c   : > { %p1002_p3 = pnand %p1000_p10, %p986_p9  ;;  %p1008_p1 = scmp.lt.s32.totalorder %s1006_s12, %s999_s9 }
  0x6e   : > { %p1003_p7 = pneg %p1002_p3  ;;  %p1009_p2 = por %p1008_p1, %p1007_p12 }
  0x70   : > { %p1010_p4 = pnand %p1009_p2, %p1003_p7 }
  0x72   : > { %1013 = shalt.err (!%p1010_p4)
}
  0x73   : > { %830 = dma.hbm_to_vmem [thread:$0]  (!%p1294_p11), %s1292_s11, 128, %s1298_s13, %s220_s16  }
  0x74   : > { %p1446_p0 = scmp.ne.s32.totalorder %s1440_s26, 0 }
  0x75   : > { %s1328_s6 = sand.u32 (!%p1446_p0), 1, %s1080_s19   ;;  %p1447_p9 = scmp.ne.s32.totalorder (!%p1446_p0), %s1438_s24, 0 }
  0x76   : > { %239 = sbr.rel (%p1446_p0) target bundleno = 807 (0x327), region = 40  ;;  %s701_s28 = sshll.u32 (!%p1446_p0), %s1328_s6, 3 }
  0x77   : > { %s242_s29 = scalar_lea.sflag (!%p1446_p0), [#allocation4], %s1328_s6  ;;  %s245_s17 = scalar_lea.vmem (!%p1446_p0), [#allocation3], %s701_s28 }
  0x7d   : > { %1059 = dma.done.wait (%p1447_p9), %s242_s29, 128  }
  0x7e   : > { %1061 = vsyncadd (%p1447_p9), %s242_s29, 4294967168  ;;  %p1448_p11 = scmp.eq.s32.totalorder %s1150_s22, 0 }
  0x80   : > { %1063 = dma.done.wait (%p1448_p11), [#allocation7], 1280   ;;  %p1449_p8 = pmov %p1448_p11 }
  0x82   : > { %1065 = vsyncadd (%p1449_p8), [#allocation7], 4294966016  ;;  %p1450_p13 = pmov %p1449_p8 }
  0x83   : > { %p1451_p6 = pmov %p1449_p8 }
  0x84   : > { %1067 = dma.done.wait (%p1450_p13), [#allocation10], 1024  }
  0x85   : > { %1069 = vsyncadd (%p1451_p6), [#allocation10], 4294966272  ;;  %v1096_v0 = vmov 0.0   ;;  %vm1097_vm0 = vmmov 0   ;;  %v882_v1 = vld [vmem:[#allocation6] sm:$0xff]   ;;  %v883_v2 = vld [vmem:[#allocation6 + $0x8] sm:$0xff]  }
  0x86   : > { %753 = vmatprep.subr.bf16.mxu0 %v1096_v0  ;;  %757 = vmatprep.mubr.msk.bf16.mxu0 %vm1097_vm0, %v1096_v0  ;;  %v285_v3 = vld [vmem:[%s245_s17] sm:$0xff]  ;;  %vm308_vm1 = vcmask 261120   ;;  %v886_v7 = vld [vmem:[#allocation8 + $0x10] sm:$0xff]   ;;  %v887_v8 = vld [vmem:[#allocation8 + $0x18] sm:$0xff]   ;;  %s729_s10 = sshll.u32 %s1150_s22, 7  ;;  %s283_s8 = scalar_lea.vmem [#allocation11], %s701_s28 }
  0x87   : > { %761 = vmatprep.subr.bf16.mxu1 %v1096_v0  ;;  %777 = vmatprep.mubr.msk.bf16.mxu1 %vm1097_vm0, %v1096_v0  ;;  %v884_v4 = vld [vmem:[#allocation8] sm:$0xff]   ;;  %v291_v5 = vpack.c.bf16 %v285_v3, %v285_v3  ;;  %v885_v6 = vld [vmem:[#allocation8 + $0x8] sm:$0xff]   ;;  %v890_v11 = vld [vmem:[#allocation8 + $0x30] sm:$0xff]   ;;  %s593_s9 = sshll.u32 %s283_s8, 4  ;;  %s1385_s12 = scalar_lea.hbm %s1434_s5, %s729_s10  ;;  %s1387_s9 = int_to_ptr.vmem [resolvable:$true] %s593_s9 }
  0x88   : > { %754 = vmatpush3.bf16.msra.mxu0 %v882_v1  ;;  %762 = vmatpush3.bf16.msra.mxu1 %v884_v4  ;;  %v888_v9 = vld [vmem:[#allocation8 + $0x20] sm:$0xff]   ;;  %v889_v10 = vld [vmem:[#allocation8 + $0x28] sm:$0xff]   ;;  %v891_v12 = vld [vmem:[#allocation8 + $0x38] sm:$0xff]   ;;  %s580_s22 = scalar_lea.sflag [#allocation5], %s1328_s6  ;;  %s1014_s29 = scalar_lea.vmem %s1387_s9, 128 }
  0x89   : > { %755 = vmatprep.subr.bf16.mxu0 %v1096_v0  ;;  %763 = vmatprep.subr.bf16.mxu1 %v1096_v0  ;;  %v892_v13 = vld [vmem:[#allocation9] sm:$0xff]   ;;  %v893_v14 = vld [vmem:[#allocation9 + $0x8] sm:$0xff]   ;;  %v894_v15 = vld [vmem:[#allocation9 + $0x10] sm:$0xff]   ;;  %p1015_p10 = scmp.ne.s32.totalorder %s1387_s9, %s1014_s29  ;;  %s1098_s28 = smov [#allocation11]  }
  0x8a   : > { %v895_v16 = vld [vmem:[#allocation9 + $0x18] sm:$0xff]   ;;  %v896_v17 = vld [vmem:[#allocation9 + $0x20] sm:$0xff]   ;;  %v897_v18 = vld [vmem:[#allocation9 + $0x28] sm:$0xff]   ;;  %s1018_s17 = sshll.u32 %s1098_s28, 4  ;;  %s1019_s17 = int_to_ptr.vmem [resolvable:$false] %s1018_s17 }
  0x8b   : > { %v706_v19 = vld [vmem:[%s1433_s4] ss:$0 sm:$0xff]  ;;  %v898_v27 = vld [vmem:[#allocation9 + $0x30] sm:$0xff]   ;;  %v899_v28 = vld [vmem:[#allocation9 + $0x38] sm:$0xff]   ;;  %p1016_p3 = pnand %p1015_p10, %p1283_p5  ;;  %s1020_s24 = scalar_lea.vmem %s1019_s17, 256 }
  0x8c   : > { %756 = vmatpush3.bf16.msra.mxu0 %v883_v2  ;;  %764 = vmatpush3.bf16.msra.mxu1 %v885_v6  ;;  %v710_v29 = vld [vmem:[%s1433_s4 + $0x1] ss:$0 sm:$0xff]  ;;  %v719_v37 = vld [vmem:[%s1433_s4 + $0x2] ss:$0 sm:$0xff]  ;;  %p1021_p12 = scmp.lt.s32.totalorder %s1387_s9, %s1019_s17  ;;  %p1022_p1 = scmp.lt.s32.totalorder %s1020_s24, %s1014_s29 }
  0x8d   : > { %781 = vmatprep.subr.bf16.mxu0 %v1096_v0  ;;  %765 = vmatprep.subr.bf16.mxu1 %v1096_v0  ;;  %p1017_p7 = pneg %p1016_p3 }
  0x8e   : > { %p1023_p2 = por %p1022_p1, %p1021_p12 }
  0x8f   : > { %758 = vmatmul.mubr.msk.bf16.vlgmr.msra.gmra.mrb[0].mxu0 %vm308_vm1, %v291_v5 }
  0x90   : > { %797 = vmatprep.mubr.msk.bf16.mxu0 %vm1097_vm0, %v1096_v0  ;;  %766 = vmatpush3.bf16.msra.mxu1 %v886_v7  ;;  %p1024_p4 = pnand %p1023_p2, %p1017_p7 }
  0x91   : > { %767 = vmatprep.subr.bf16.mxu1 %v1096_v0  ;;  %782 = vmatpush3.bf16.msra.mxu0 %v892_v13 }
  0x92   : > { %783 = vmatprep.subr.bf16.mxu0 %v1096_v0 }
  0x94   : > { %768 = vmatpush3.bf16.msra.mxu1 %v887_v8 }
  0x95   : > { %769 = vmatprep.subr.bf16.mxu1 %v1096_v0  ;;  %784 = vmatpush3.bf16.msra.mxu0 %v893_v14 }
  0x96   : > { %785 = vmatprep.subr.bf16.mxu0 %v1096_v0 }
  0x98   : > { %770 = vmatpush3.bf16.msra.mxu1 %v888_v9 }
  0x99   : > { %771 = vmatprep.subr.bf16.mxu1 %v1096_v0  ;;  %786 = vmatpush3.bf16.msra.mxu0 %v894_v15 }
  0x9a   : > { %787 = vmatprep.subr.bf16.mxu0 %v1096_v0 }
  0x9c   : > { %772 = vmatpush3.bf16.msra.mxu1 %v889_v10 }
  0x9d   : > { %773 = vmatprep.subr.bf16.mxu1 %v1096_v0  ;;  %788 = vmatpush3.bf16.msra.mxu0 %v895_v16 }
  0x9e   : > { %789 = vmatprep.subr.bf16.mxu0 %v1096_v0 }
  0xa0   : > { %774 = vmatpush3.bf16.msra.mxu1 %v890_v11 }
  0xa1   : > { %775 = vmatprep.subr.bf16.mxu1 %v1096_v0  ;;  %790 = vmatpush3.bf16.msra.mxu0 %v896_v17 }
  0xa2   : > { %791 = vmatprep.subr.bf16.mxu0 %v1096_v0 }
  0xa4   : > { %776 = vmatpush3.bf16.msra.mxu1 %v891_v12 }
  0xa5   : > { %792 = vmatpush3.bf16.msra.mxu0 %v897_v18 }
  0xa6   : > { %793 = vmatprep.subr.bf16.mxu0 %v1096_v0 }
  0xa9   : > { %794 = vmatpush3.bf16.msra.mxu0 %v898_v27 }
  0xaa   : > { %795 = vmatprep.subr.bf16.mxu0 %v1096_v0 }
  0xad   : > { %796 = vmatpush3.bf16.msra.mxu0 %v899_v28 }
 0x162   : > { %v346_v20 = vpop.f32.mrb[0].mxu0 }
 0x163   : > { %v347_v21 = vadd.f32 %v706_v19, %v346_v20  ;;  %v759_v22 = vpop.f32.mrb[1].mxu0 }
 0x164   : > { %v349_v23 = vpop.f32.mrb[2].mxu0 }
 0x165   : > { %v352_v24 = vmax.f32 %v347_v21, 0.0  ;;  %v760_v25 = vpop.f32.mrb[3].mxu0 }
 0x167   : > { %v372_v26 = vpack.c.bf16 %v352_v24, %v352_v24 }
 0x169   : > { %778 = vmatmul.mubr.bf16.vlgmr.msra.gmra.mrb[0].mxu1 %v372_v26 }
 0x23c   : > { %v459_v30 = vpop.f32.mrb[0].mxu1 }
 0x23d   : > { %v460_v31 = vadd.f32 %v710_v29, %v459_v30  ;;  %v779_v32 = vpop.f32.mrb[1].mxu1 }
 0x23e   : > { %v462_v33 = vpop.f32.mrb[2].mxu1 }
 0x23f   : > { %v465_v34 = vmax.f32 %v460_v31, 0.0  ;;  %v780_v35 = vpop.f32.mrb[3].mxu1 }
 0x241   : > { %v485_v36 = vpack.c.bf16 %v465_v34, %v465_v34 }
 0x243   : > { %798 = vmatmul.mubr.bf16.vlgmr.msra.gmra.mrb[4].mxu0 %v485_v36 }
 0x316   : > { %v572_v38 = vpop.f32.mrb[4].mxu0 }
 0x317   : > { %v573_v39 = vadd.f32 %v719_v37, %v572_v38  ;;  %v799_v40 = vpop.f32.mrb[5].mxu0 }
 0x318   : > { %v575_v41 = vpop.f32.mrb[6].mxu0 }
 0x319   : > { %578 = vst [vmem:[%s283_s8] sm:$0xff] %v573_v39  ;;  %v800_v42 = vpop.f32.mrb[7].mxu0 }
 0x31a   : > { %1027 = shalt.err (!%p1024_p4)
}
 0x31b   : > { %s1028_s6 = scalar_lea.hbm %s1385_s12, 128  ;;  %s1032_s13 = scalar_lea.hbm %s1434_s5, 256 }
 0x31c   : > { %p1029_p0 = scmp.ne.s32.totalorder %s1385_s12, %s1028_s6  ;;  %p1033_p8 = scmp.lt.u32.totalorder %s1385_s12, %s1434_s5 }
 0x31d   : > { %p1034_p13 = scmp.lt.u32.totalorder %s1032_s13, %s1028_s6  ;;  %p1036_p10 = scmp.lt.u32.totalorder %s1028_s6, %s1385_s12 }
 0x31e   : > { %p1030_p9 = pnand %p1029_p0, %p1283_p5 }
 0x31f   : > { %p1035_p6 = por %p1034_p13, %p1033_p8 }
 0x320   : > { %p1031_p11 = pneg %p1030_p9 }
 0x321   : > { %p1037_p3 = por %p1036_p10, %p1035_p6 }
 0x323   : > { %p1038_p7 = pnand %p1037_p3, %p1031_p11 }
 0x325   : > { %1041 = shalt.err (!%p1038_p7)
}
 0x326   : > { %815 = dma.vmem_to_hbm [thread:$0]  (%p1283_p5), %s1387_s9, 128, %s1385_s12, %s580_s22  }
 0x327 PF: > { %s605_s10 = sand.u32 1, %s1076_s18   ;;  %p1452_p12 = scmp.ne.s32.totalorder %s1439_s25, 0 }
 0x328   : > { %p1453_p1 = scmp.ge.s32.totalorder %s1088_s21, 2  ;;  %s606_s8 = scalar_lea.sflag [#allocation5], %s605_s10 }
 0x32a   : > { %p832_p2 = pnand %p1453_p1, %p1452_p12 }
 0x32c   : > { %1071 = dma.done.wait (!%p832_p2), %s606_s8, 128  }
 0x32d   : > { %1073 = vsyncadd (!%p832_p2), %s606_s8, 4294967168  ;;  %p20_p4 = scmp.ge.s32.totalorder %s1269_s14, 4   ;;  %s1454_s18 = smov %s1080_s19 }
 0x32e   : > { %s1455_s19 = smov %s1084_s20  ;;  %s1456_s20 = smov %s1279_s30 }
 0x32f   : > { %s1457_s21 = smov %s1269_s14  ;;  %22 = sbr.rel (!%p20_p4) target bundleno = 7 (0x7), region = 97 }
 0x336   :  { %611 = vsyncpa [#allocation4], 1 }
 0x337   :  { %613 = vsyncpa [#allocation4 + $0x1], 1 }
 0x338   :  { %614 = vsyncpa [#allocation7], 1 }
 0x339   :  { %615 = vsyncpa [#allocation10], 1 }
 0x33a   :  { %616 = vsyncpa [#allocation5], 1 }
 0x33b   :  { %618 = vsyncpa [#allocation5 + $0x1], 1 }

// kernel: tpu_custom_call.1
= control target key start
LH: loop header
LB: loop body
LE: loop exit
PB: predicated region body
PF: predicated region fallthrough
CT: control target
= control target key end

     0   :  { %10 = vsyncpa [#allocation4], 0  ;;  %s1429_s0 = inlined_call_operand.hbm [shape: f32[16,32], index: 0, kind: input, shape index: {}]   ;;  %s1430_s1 = inlined_call_operand.hbm [shape: bf16[32,128], index: 1, kind: input, shape index: {}]   ;;  %s1431_s2 = inlined_call_operand.hbm [shape: bf16[128,128], index: 2, kind: input, shape index: {}]   ;;  %s1432_s3 = inlined_call_operand.hbm [shape: bf16[128,128], index: 3, kind: input, shape index: {}]   ;;  %s1433_s4 = inlined_call_operand.vmem [shape: f32[3,128], index: 4, kind: input, shape index: {}]   ;;  %s1434_s5 = inlined_call_operand.hbm [shape: f32[16,128], index: 5, kind: output, shape index: {}]  }
   0x1   :  { %12 = vsyncpa [#allocation4 + $0x1], 0 }
   0x2   :  { %13 = vsyncpa [#allocation7], 0 }
   0x3   :  { %14 = vsyncpa [#allocation10], 0 }
   0x4   :  { %15 = vsyncpa [#allocation5], 0 }
   0x5   :  { %17 = vsyncpa [#allocation5 + $0x1], 0  ;;  %s1129_s18 = smov 0   ;;  %s1131_s19 = smov 0  }
   0x6   :  { %s1133_s20 = smov 0   ;;  %s1135_s21 = smov 0  }
   0x7 LB: > { %s1150_s22 = sadd.s32 4294967295, %s1088_s21   ;;  %s692_s23 = sadd.s32 4294967294, %s1088_s21   ;;  %s1088_s21 = sphi %s1135_s21, %s1457_s21   ;;  %s1084_s20 = sphi %s1133_s20, %s1456_s20   ;;  %s1080_s19 = sphi %s1131_s19, %s1455_s19   ;;  %s1076_s18 = sphi %s1129_s18, %s1454_s18  }
   0x8   : > { %p43_p0 = scmp.ne.s32.totalorder %s1080_s19, %s1076_s18  ;;  %p1435_p1 = scmp.eq.s32.totalorder %s1150_s22, 0 }
   0x9   : > { %p157_p3 = scmp.eq.s32.totalorder %s692_s23, 1  ;;  %p693_p5 = scmp.ge.s32.totalorder %s1088_s21, 1 }
   0xa   : > { %p1159_p4 = por %p1435_p1, %p43_p0  ;;  %p164_p7 = scmp.lt.s32.totalorder %s1088_s21, 3 }
   0xb   : > { %p1164_p6 = por %p157_p3, %p43_p0  ;;  %s1090_s27 = smov [#allocation6]  }
   0xc   : > { %s1438_s24 = scalar_select %p1159_p4, 1, 0 }
   0xd   : > { %s1439_s25 = scalar_select %p1164_p6, 1, 0 }
   0xe   : > { %p1169_p8 = pnand %p693_p5, %p164_p7  ;;  %s176_s28 = sshll.u32 %s1090_s27, 4  ;;  %s1173_s28 = int_to_ptr.vmem [resolvable:$true] %s176_s28 }
   0xf   : > { %s1091_s30 = smov [#allocation8]   ;;  %s1092_s7 = smov [#allocation9]  }
  0x10   : > { %s1440_s26 = scalar_select %p1169_p8, 1, 0 }
  0x11   : > { %p817_p9 = pneg %p1169_p8  ;;  %s189_s6 = sshll.u32 %s1091_s30, 4  ;;  %s1184_s6 = int_to_ptr.vmem [resolvable:$true] %s189_s6 }
  0x12   : > { %s1186_s8 = sshll.u32 %s1092_s7, 4  ;;  %s900_s11 = scalar_lea.hbm %s1430_s1, 256  ;;  %s203_s8 = int_to_ptr.vmem [resolvable:$true] %s1186_s8 }
  0x13   : > { %p1180_p11 = pnand %p817_p9, %p1435_p1  ;;  %p901_p12 = scmp.ne.s32.totalorder %s1430_s1, %s900_s11 }
  0x14   : > { %p907_p5 = scmp.lt.u32.totalorder %s900_s11, %s1430_s1 }
  0x15   : > { %p1196_p13 = pneg %p1180_p11 }
  0x17   : > { %p903_p0 = pnand %p1196_p13, %p901_p12 }
  0x19   : > { %p904_p3 = pneg %p903_p0 }
  0x1b   : > { %p909_p7 = pnand %p907_p5, %p904_p3 }
  0x1d   : > { %912 = shalt.err (!%p909_p7)
}
  0x1e   : > { %s913_s17 = scalar_lea.vmem %s1173_s28, 256  ;;  %p921_p2 = scmp.lt.s32.totalorder %s1173_s28, %s1173_s28 }
  0x1f   : > { %p914_p9 = scmp.ne.s32.totalorder %s1173_s28, %s913_s17  ;;  %p922_p6 = scmp.lt.s32.totalorder %s913_s17, %s913_s17 }
  0x21   : > { %p916_p10 = pnand %p914_p9, %p1196_p13  ;;  %p923_p12 = por %p922_p6, %p921_p2 }
  0x23   : > { %p917_p1 = pneg %p916_p10 }
  0x25   : > { %p924_p0 = pnand %p923_p12, %p917_p1 }
  0x27   : > { %927 = shalt.err (!%p924_p0)
}
  0x28   : > { %s1093_s23 = smov 64   ;;  %s1094_s27 = smov 4  }
  0x29   : > { %820 = dma.hbm_to_vmem [thread:$0]  (!%p1180_p11), %s1430_s1, 256, %s1173_s28, [#allocation7], %s1093_s23, %s1093_s23, %s1094_s27  }
  0x2a   : > { %s928_s11 = scalar_lea.hbm %s1431_s2, 1024 }
  0x2b   : > { %p929_p1 = scmp.ne.s32.totalorder %s1431_s2, %s928_s11  ;;  %p935_p10 = scmp.lt.u32.totalorder %s928_s11, %s1431_s2 }
  0x2d   : > { %p931_p2 = pnand %p929_p1, %p1196_p13 }
  0x2f   : > { %p932_p6 = pneg %p931_p2 }
  0x31   : > { %p937_p3 = pnand %p935_p10, %p932_p6 }
  0x33   : > { %940 = shalt.err (!%p937_p3)
}
  0x34   : > { %s941_s28 = scalar_lea.vmem %s1184_s6, 1024  ;;  %p949_p12 = scmp.lt.s32.totalorder %s1184_s6, %s1184_s6 }
  0x35   : > { %p942_p5 = scmp.ne.s32.totalorder %s1184_s6, %s941_s28  ;;  %p950_p0 = scmp.lt.s32.totalorder %s941_s28, %s941_s28 }
  0x37   : > { %p944_p7 = pnand %p942_p5, %p1196_p13  ;;  %p951_p1 = por %p950_p0, %p949_p12 }
  0x39   : > { %p945_p9 = pneg %p944_p7 }
  0x3b   : > { %p952_p2 = pnand %p951_p1, %p945_p9 }
  0x3d   : > { %955 = shalt.err (!%p952_p2)
}
  0x3e   : > { %823 = dma.hbm_to_vmem [thread:$0]  (!%p1180_p11), %s1431_s2, 1024, %s1184_s6, [#allocation7], %s1093_s23, %s1093_s23, %s1094_s27  }
  0x3f   : > { %s956_s10 = scalar_lea.hbm %s1432_s3, 1024 }
  0x40   : > { %p957_p6 = scmp.ne.s32.totalorder %s1432_s3, %s956_s10  ;;  %p963_p5 = scmp.lt.u32.totalorder %s956_s10, %s1432_s3 }
  0x42   : > { %p959_p10 = pnand %p957_p6, %p1196_p13 }
  0x44   : > { %p960_p3 = pneg %p959_p10 }
  0x46   : > { %p965_p7 = pnand %p963_p5, %p960_p3 }
  0x48   : > { %968 = shalt.err (!%p965_p7)
}
  0x49   : > { %s969_s16 = scalar_lea.vmem %s203_s8, 1024  ;;  %p977_p1 = scmp.lt.s32.totalorder %s203_s8, %s203_s8 }
  0x4a   : > { %p970_p9 = scmp.ne.s32.totalorder %s203_s8, %s969_s16  ;;  %p978_p2 = scmp.lt.s32.totalorder %s969_s16, %s969_s16 }
  0x4c   : > { %p972_p12 = pnand %p970_p9, %p1196_p13  ;;  %p979_p4 = por %p978_p2, %p977_p1 }
  0x4e   : > { %p973_p0 = pneg %p972_p12 }
  0x50   : > { %p980_p8 = pnand %p979_p4, %p973_p0 }
  0x52   : > { %983 = shalt.err (!%p980_p8)
}
  0x53   : > { %826 = dma.hbm_to_vmem [thread:$0]  (!%p1180_p11), %s1432_s3, 1024, %s203_s8, [#allocation10], %s1093_s23, %s1093_s23, %s1094_s27  }
  0x54   : > { %s1269_s14 = sadd.s32 1, %s1088_s21   ;;  %s30_s17 = sadd.s32 1, %s1084_s20 }
  0x55   : > { %s27_s29 = ssub.s32 %s1088_s21, %s1269_s14  ;;  %p37_p8 = scmp.ne.s32.totalorder %s1084_s20, %s1080_s19 }
  0x56   : > { %p28_p4 = scmp.eq.s32.totalorder %s27_s29, 0  ;;  %p38_p13 = scmp.eq.s32.totalorder %s1088_s21, 0 }
  0x57   : > { %p838_p6 = scmp.lt.s32.totalorder %s1088_s21, 2  ;;  %p1443_p3 = scmp.eq.s32.totalorder %s1150_s22, 1 }
  0x58   : > { %s1279_s30 = scalar_select %p28_p4, %s1084_s20, %s30_s17  }
  0x59   : > { %p39_p10 = por %p38_p13, %p37_p8  ;;  %p1283_p5 = por %p1443_p3, %p37_p8 }
  0x5a   : > { %s219_s9 = sand.u32 1, %s1084_s20   ;;  %s699_s10 = sshll.u32 %s1088_s21, 7 }
  0x5b   : > { %s698_s8 = sshll.u32 %s219_s9, 3  ;;  %s1292_s11 = scalar_lea.hbm %s1429_s0, %s699_s10 }
  0x5c   : > { %s223_s12 = scalar_lea.vmem [#allocation3], %s698_s8  ;;  %p1294_p11 = pnand %p838_p6, %p39_p10 }
  0x5d   : > { %s230_s13 = sshll.u32 %s223_s12, 4  ;;  %s220_s16 = scalar_lea.sflag [#allocation4], %s219_s9  ;;  %s1298_s13 = int_to_ptr.vmem [resolvable:$true] %s230_s13 }
  0x5e   : > { %s984_s6 = scalar_lea.hbm %s1292_s11, 128  ;;  %p986_p9 = pneg %p1294_p11 }
  0x5f   : > { %p985_p7 = scmp.ne.s32.totalorder %s1292_s11, %s984_s6  ;;  %s989_s17 = scalar_lea.hbm %s1429_s0, 256 }
  0x60   : > { %p990_p1 = scmp.lt.u32.totalorder %s1292_s11, %s1429_s0  ;;  %p991_p2 = scmp.lt.u32.totalorder %s989_s17, %s984_s6 }
  0x61   : > { %p987_p12 = pnand %p986_p9, %p985_p7  ;;  %p993_p8 = scmp.lt.u32.totalorder %s984_s6, %s1292_s11 }
  0x62   : > { %p992_p4 = por %p991_p2, %p990_p1 }
  0x63   : > { %p988_p0 = pneg %p987_p12 }
  0x64   : > { %p994_p13 = por %p993_p8, %p992_p4 }
  0x66   : > { %p995_p6 = pnand %p994_p13, %p988_p0 }
  0x68   : > { %998 = shalt.err (!%p995_p6)
}
  0x69   : > { %s999_s9 = scalar_lea.vmem %s1298_s13, 128  ;;  %s1095_s23 = smov [#allocation3]  }
  0x6a   : > { %p1000_p10 = scmp.ne.s32.totalorder %s1298_s13, %s999_s9  ;;  %s1004_s27 = sshll.u32 %s1095_s23, 4  ;;  %s1005_s27 = int_to_ptr.vmem [resolvable:$false] %s1004_s27 }
  0x6b   : > { %s1006_s12 = scalar_lea.vmem %s1005_s27, 256  ;;  %p1007_p12 = scmp.lt.s32.totalorder %s1298_s13, %s1005_s27 }
  0x6c   : > { %p1002_p3 = pnand %p1000_p10, %p986_p9  ;;  %p1008_p1 = scmp.lt.s32.totalorder %s1006_s12, %s999_s9 }
  0x6e   : > { %p1003_p7 = pneg %p1002_p3  ;;  %p1009_p2 = por %p1008_p1, %p1007_p12 }
  0x70   : > { %p1010_p4 = pnand %p1009_p2, %p1003_p7 }
  0x72   : > { %1013 = shalt.err (!%p1010_p4)
}
  0x73   : > { %830 = dma.hbm_to_vmem [thread:$0]  (!%p1294_p11), %s1292_s11, 128, %s1298_s13, %s220_s16  }
  0x74   : > { %p1446_p0 = scmp.ne.s32.totalorder %s1440_s26, 0 }
  0x75   : > { %s1328_s6 = sand.u32 (!%p1446_p0), 1, %s1080_s19   ;;  %p1447_p9 = scmp.ne.s32.totalorder (!%p1446_p0), %s1438_s24, 0 }
  0x76   : > { %239 = sbr.rel (%p1446_p0) target bundleno = 807 (0x327), region = 40  ;;  %s701_s28 = sshll.u32 (!%p1446_p0), %s1328_s6, 3 }
  0x77   : > { %s242_s29 = scalar_lea.sflag (!%p1446_p0), [#allocation4], %s1328_s6  ;;  %s245_s17 = scalar_lea.vmem (!%p1446_p0), [#allocation3], %s701_s28 }
  0x7d   : > { %1059 = dma.done.wait (%p1447_p9), %s242_s29, 128  }
  0x7e   : > { %1061 = vsyncadd (%p1447_p9), %s242_s29, 4294967168  ;;  %p1448_p11 = scmp.eq.s32.totalorder %s1150_s22, 0 }
  0x80   : > { %1063 = dma.done.wait (%p1448_p11), [#allocation7], 1280   ;;  %p1449_p8 = pmov %p1448_p11 }
  0x82   : > { %1065 = vsyncadd (%p1449_p8), [#allocation7], 4294966016  ;;  %p1450_p13 = pmov %p1449_p8 }
  0x83   : > { %p1451_p6 = pmov %p1449_p8 }
  0x84   : > { %1067 = dma.done.wait (%p1450_p13), [#allocation10], 1024  }
  0x85   : > { %1069 = vsyncadd (%p1451_p6), [#allocation10], 4294966272  ;;  %v1096_v0 = vmov 0.0   ;;  %vm1097_vm0 = vmmov 0   ;;  %v882_v1 = vld [vmem:[#allocation6] sm:$0xff]   ;;  %v883_v2 = vld [vmem:[#allocation6 + $0x8] sm:$0xff]  }
  0x86   : > { %753 = vmatprep.subr.bf16.mxu0 %v1096_v0  ;;  %757 = vmatprep.mubr.msk.bf16.mxu0 %vm1097_vm0, %v1096_v0  ;;  %v285_v3 = vld [vmem:[%s245_s17] sm:$0xff]  ;;  %vm308_vm1 = vcmask 261120   ;;  %v886_v7 = vld [vmem:[#allocation8 + $0x10] sm:$0xff]   ;;  %v887_v8 = vld [vmem:[#allocation8 + $0x18] sm:$0xff]   ;;  %s729_s10 = sshll.u32 %s1150_s22, 7  ;;  %s283_s8 = scalar_lea.vmem [#allocation11], %s701_s28 }
  0x87   : > { %761 = vmatprep.subr.bf16.mxu1 %v1096_v0  ;;  %777 = vmatprep.mubr.msk.bf16.mxu1 %vm1097_vm0, %v1096_v0  ;;  %v884_v4 = vld [vmem:[#allocation8] sm:$0xff]   ;;  %v291_v5 = vpack.c.bf16 %v285_v3, %v285_v3  ;;  %v885_v6 = vld [vmem:[#allocation8 + $0x8] sm:$0xff]   ;;  %v890_v11 = vld [vmem:[#allocation8 + $0x30] sm:$0xff]   ;;  %s593_s9 = sshll.u32 %s283_s8, 4  ;;  %s1385_s12 = scalar_lea.hbm %s1434_s5, %s729_s10  ;;  %s1387_s9 = int_to_ptr.vmem [resolvable:$true] %s593_s9 }
  0x88   : > { %754 = vmatpush3.bf16.msra.mxu0 %v882_v1  ;;  %762 = vmatpush3.bf16.msra.mxu1 %v884_v4  ;;  %v888_v9 = vld [vmem:[#allocation8 + $0x20] sm:$0xff]   ;;  %v889_v10 = vld [vmem:[#allocation8 + $0x28] sm:$0xff]   ;;  %v891_v12 = vld [vmem:[#allocation8 + $0x38] sm:$0xff]   ;;  %s580_s22 = scalar_lea.sflag [#allocation5], %s1328_s6  ;;  %s1014_s29 = scalar_lea.vmem %s1387_s9, 128 }
  0x89   : > { %755 = vmatprep.subr.bf16.mxu0 %v1096_v0  ;;  %763 = vmatprep.subr.bf16.mxu1 %v1096_v0  ;;  %v892_v13 = vld [vmem:[#allocation9] sm:$0xff]   ;;  %v893_v14 = vld [vmem:[#allocation9 + $0x8] sm:$0xff]   ;;  %v894_v15 = vld [vmem:[#allocation9 + $0x10] sm:$0xff]   ;;  %p1015_p10 = scmp.ne.s32.totalorder %s1387_s9, %s1014_s29  ;;  %s1098_s28 = smov [#allocation11]  }
  0x8a   : > { %v895_v16 = vld [vmem:[#allocation9 + $0x18] sm:$0xff]   ;;  %v896_v17 = vld [vmem:[#allocation9 + $0x20] sm:$0xff]   ;;  %v897_v18 = vld [vmem:[#allocation9 + $0x28] sm:$0xff]   ;;  %s1018_s17 = sshll.u32 %s1098_s28, 4  ;;  %s1019_s17 = int_to_ptr.vmem [resolvable:$false] %s1018_s17 }
  0x8b   : > { %v706_v19 = vld [vmem:[%s1433_s4] ss:$0 sm:$0xff]  ;;  %v898_v27 = vld [vmem:[#allocation9 + $0x30] sm:$0xff]   ;;  %v899_v28 = vld [vmem:[#allocation9 + $0x38] sm:$0xff]   ;;  %p1016_p3 = pnand %p1015_p10, %p1283_p5  ;;  %s1020_s24 = scalar_lea.vmem %s1019_s17, 256 }
  0x8c   : > { %756 = vmatpush3.bf16.msra.mxu0 %v883_v2  ;;  %764 = vmatpush3.bf16.msra.mxu1 %v885_v6  ;;  %v710_v29 = vld [vmem:[%s1433_s4 + $0x1] ss:$0 sm:$0xff]  ;;  %v719_v37 = vld [vmem:[%s1433_s4 + $0x2] ss:$0 sm:$0xff]  ;;  %p1021_p12 = scmp.lt.s32.totalorder %s1387_s9, %s1019_s17  ;;  %p1022_p1 = scmp.lt.s32.totalorder %s1020_s24, %s1014_s29 }
  0x8d   : > { %781 = vmatprep.subr.bf16.mxu0 %v1096_v0  ;;  %765 = vmatprep.subr.bf16.mxu1 %v1096_v0  ;;  %p1017_p7 = pneg %p1016_p3 }
  0x8e   : > { %p1023_p2 = por %p1022_p1, %p1021_p12 }
  0x8f   : > { %758 = vmatmul.mubr.msk.bf16.vlgmr.msra.gmra.mrb[0].mxu0 %vm308_vm1, %v291_v5 }
  0x90   : > { %797 = vmatprep.mubr.msk.bf16.mxu0 %vm1097_vm0, %v1096_v0  ;;  %766 = vmatpush3.bf16.msra.mxu1 %v886_v7  ;;  %p1024_p4 = pnand %p1023_p2, %p1017_p7 }
  0x91   : > { %767 = vmatprep.subr.bf16.mxu1 %v1096_v0  ;;  %782 = vmatpush3.bf16.msra.mxu0 %v892_v13 }
  0x92   : > { %783 = vmatprep.subr.bf16.mxu0 %v1096_v0 }
  0x94   : > { %768 = vmatpush3.bf16.msra.mxu1 %v887_v8 }
  0x95   : > { %769 = vmatprep.subr.bf16.mxu1 %v1096_v0  ;;  %784 = vmatpush3.bf16.msra.mxu0 %v893_v14 }
  0x96   : > { %785 = vmatprep.subr.bf16.mxu0 %v1096_v0 }
  0x98   : > { %770 = vmatpush3.bf16.msra.mxu1 %v888_v9 }
  0x99   : > { %771 = vmatprep.subr.bf16.mxu1 %v1096_v0  ;;  %786 = vmatpush3.bf16.msra.mxu0 %v894_v15 }
  0x9a   : > { %787 = vmatprep.subr.bf16.mxu0 %v1096_v0 }
  0x9c   : > { %772 = vmatpush3.bf16.msra.mxu1 %v889_v10 }
  0x9d   : > { %773 = vmatprep.subr.bf16.mxu1 %v1096_v0  ;;  %788 = vmatpush3.bf16.msra.mxu0 %v895_v16 }
  0x9e   : > { %789 = vmatprep.subr.bf16.mxu0 %v1096_v0 }
  0xa0   : > { %774 = vmatpush3.bf16.msra.mxu1 %v890_v11 }
  0xa1   : > { %775 = vmatprep.subr.bf16.mxu1 %v1096_v0  ;;  %790 = vmatpush3.bf16.msra.mxu0 %v896_v17 }
  0xa2   : > { %791 = vmatprep.subr.bf16.mxu0 %v1096_v0 }
  0xa4   : > { %776 = vmatpush3.bf16.msra.mxu1 %v891_v12 }
  0xa5   : > { %792 = vmatpush3.bf16.msra.mxu0 %v897_v18 }
  0xa6   : > { %793 = vmatprep.subr.bf16.mxu0 %v1096_v0 }
  0xa9   : > { %794 = vmatpush3.bf16.msra.mxu0 %v898_v27 }
  0xaa   : > { %795 = vmatprep.subr.bf16.mxu0 %v1096_v0 }
  0xad   : > { %796 = vmatpush3.bf16.msra.mxu0 %v899_v28 }
 0x162   : > { %v346_v20 = vpop.f32.mrb[0].mxu0 }
 0x163   : > { %v347_v21 = vadd.f32 %v706_v19, %v346_v20  ;;  %v759_v22 = vpop.f32.mrb[1].mxu0 }
 0x164   : > { %v349_v23 = vpop.f32.mrb[2].mxu0 }
 0x165   : > { %v352_v24 = vmax.f32 %v347_v21, 0.0  ;;  %v760_v25 = vpop.f32.mrb[3].mxu0 }
 0x167   : > { %v372_v26 = vpack.c.bf16 %v352_v24, %v352_v24 }
 0x169   : > { %778 = vmatmul.mubr.bf16.vlgmr.msra.gmra.mrb[0].mxu1 %v372_v26 }
 0x23c   : > { %v459_v30 = vpop.f32.mrb[0].mxu1 }
 0x23d   : > { %v460_v31 = vadd.f32 %v710_v29, %v459_v30  ;;  %v779_v32 = vpop.f32.mrb[1].mxu1 }
 0x23e   : > { %v462_v33 = vpop.f32.mrb[2].mxu1 }
 0x23f   : > { %v465_v34 = vmax.f32 %v460_v31, 0.0  ;;  %v780_v35 = vpop.f32.mrb[3].mxu1 }
 0x241   : > { %v485_v36 = vpack.c.bf16 %v465_v34, %v465_v34 }
 0x243   : > { %798 = vmatmul.mubr.bf16.vlgmr.msra.gmra.mrb[4].mxu0 %v485_v36 }
 0x316   : > { %v572_v38 = vpop.f32.mrb[4].mxu0 }
 0x317   : > { %v573_v39 = vadd.f32 %v719_v37, %v572_v38  ;;  %v799_v40 = vpop.f32.mrb[5].mxu0 }
 0x318   : > { %v575_v41 = vpop.f32.mrb[6].mxu0 }
 0x319   : > { %578 = vst [vmem:[%s283_s8] sm:$0xff] %v573_v39  ;;  %v800_v42 = vpop.f32.mrb[7].mxu0 }
 0x31a   : > { %1027 = shalt.err (!%p1024_p4)
}
 0x31b   : > { %s1028_s6 = scalar_lea.hbm %s1385_s12, 128  ;;  %s1032_s13 = scalar_lea.hbm %s1434_s5, 256 }
 0x31c   : > { %p1029_p0 = scmp.ne.s32.totalorder %s1385_s12, %s1028_s6  ;;  %p1033_p8 = scmp.lt.u32.totalorder %s1385_s12, %s1434_s5 }
 0x31d   : > { %p1034_p13 = scmp.lt.u32.totalorder %s1032_s13, %s1028_s6  ;;  %p1036_p10 = scmp.lt.u32.totalorder %s1028_s6, %s1385_s12 }
 0x31e   : > { %p1030_p9 = pnand %p1029_p0, %p1283_p5 }
 0x31f   : > { %p1035_p6 = por %p1034_p13, %p1033_p8 }
 0x320   : > { %p1031_p11 = pneg %p1030_p9 }
 0x321   : > { %p1037_p3 = por %p1036_p10, %p1035_p6 }
 0x323   : > { %p1038_p7 = pnand %p1037_p3, %p1031_p11 }
 0x325   : > { %1041 = shalt.err (!%p1038_p7)
}
 0x326   : > { %815 = dma.vmem_to_hbm [thread:$0]  (%p1283_p5), %s1387_s9, 128, %s1385_s12, %s580_s22  }
 0x327 PF: > { %s605_s10 = sand.u32 1, %s1076_s18   ;;  %p1452_p12 = scmp.ne.s32.totalorder %s1439_s25, 0 }
 0x328   : > { %p1453_p1 = scmp.ge.s32.totalorder %s1088_s21, 2  ;;  %s606_s8 = scalar_lea.sflag [#allocation5], %s605_s10 }
 0x32a   : > { %p832_p2 = pnand %p1453_p1, %p1452_p12 }
 0x32c   : > { %1071 = dma.done.wait (!%p832_p2), %s606_s8, 128  }
 0x32d   : > { %1073 = vsyncadd (!%p832_p2), %s606_s8, 4294967168  ;;  %p20_p4 = scmp.ge.s32.totalorder %s1269_s14, 4   ;;  %s1454_s18 = smov %s1080_s19 }
 0x32e   : > { %s1455_s19 = smov %s1084_s20  ;;  %s1456_s20 = smov %s1279_s30 }
 0x32f   : > { %s1457_s21 = smov %s1269_s14  ;;  %22 = sbr.rel (!%p20_p4) target bundleno = 7 (0x7), region = 97 }
 0x336   :  { %611 = vsyncpa [#allocation4], 1 }
 0x337   :  { %613 = vsyncpa [#allocation4 + $0x1], 1 }
 0x338   :  { %614 = vsyncpa [#allocation7], 1 }
 0x339   :  { %615 = vsyncpa [#allocation10], 1 }
 0x33a   :  { %616 = vsyncpa [#allocation5], 1 }
 0x33b   :  { %618 = vsyncpa [#allocation5 + $0x1], 1 }

</bundles_post_ra>
